<compile_context>
chip_gen: v7x
topology: tpu7x:2x2x1
jax: 0.10.0
libtpu: 0.0.40
codegen_flags: <defaults>
</compile_context>

<pallas_src>
import functools

import jax
import jax.numpy as jnp
from jax.experimental import pallas as pl
from jax.experimental.pallas import tpu as pltpu


# ----------------------------------------------------------------------------
# Helpers: VMEM budgeting & tile planning
# ----------------------------------------------------------------------------
def _round_up(a, b):
    return ((a + b - 1) // b) * b


def _vmem_budget():
    try:
        vmem_phys = int(pltpu.get_tpu_info().vmem_capacity_bytes)
    except Exception:
        vmem_phys = 64 << 20                       # v7x per-TC worst case
    vmem_limit = max(32 << 20, min((vmem_phys * 3) // 4, 127 << 20))
    # Two double-buffered input blocks should use <= ~80% of the scoped limit;
    # a few MiB per block already sits on the HBM-roofline plateau.
    blk_cap = min((vmem_limit * 4) // 10, 8 << 20)
    return vmem_limit, blk_cap


def _megacore_split(tile, extent, other_steps, unit, bytes_per_unit):
    """v7x has two TensorCores; with a 'parallel' grid prefer an even step
    count >= 4, but only if each block stays >= 512 KiB (keeps the ~0.35us
    per-step overhead negligible).  No-op on tiny inputs."""
    def total(t):
        return (-(-extent // t)) * other_steps

    if total(tile) >= 4 and total(tile) % 2 == 0:
        return tile
    for div in (2, 4, 8):
        t = ((tile // div) // unit) * unit
        if t < unit or t * bytes_per_unit < (512 << 10):
            break
        g = total(t)
        if g >= 4 and g % 2 == 0:
            return t
    return tile


def _plan_mean_tiles(R, L, itemsize, blk_cap):
    """Tiling for the (1, R, L) dense view used by the mean/batchmean path."""
    pack = 8 * max(1, 4 // itemsize)               # sublane packing (f32:8, bf16:16)
    l_pad = _round_up(L, 128)
    row_bytes = l_pad * itemsize

    if pack * row_bytes <= blk_cap:
        # Contiguous full-width rows; tile (and megacore-split) over rows.
        tile_l = L
        tile_r = min(_round_up(R, pack), (blk_cap // row_bytes) // pack * pack)
        if tile_r >= R:
            tile_r = R
        tile_r = _megacore_split(tile_r, R, 1, pack, row_bytes)
        if tile_r >= R:
            tile_r = R
    else:
        # Extremely wide rows: a handful of rows per block, tile the lane dim.
        tile_r = min(R, pack)
        tile_l = min(l_pad, max(128, (blk_cap // (pack * itemsize)) // 128 * 128))
        if tile_l >= L:
            tile_l = L
    grid_r = -(-R // tile_r)
    grid_l = -(-L // tile_l)
    return tile_r, tile_l, grid_r, grid_l


def _plan_sum_tiles(N, C, L, itemsize, blk_cap):
    """Tiling for the (N, C, L) view used by the reduction=='sum' path."""
    pack = 8 * max(1, 4 // itemsize)
    c_pad = _round_up(C, pack)
    l_pad = _round_up(L, 128)
    lane_bytes = N * c_pad * itemsize              # bytes per lane at full N

    if 128 * lane_bytes <= blk_cap:
        tile_n = N
        tile_l = min(l_pad, (blk_cap // lane_bytes) // 128 * 128)
        if tile_l >= L:
            tile_l = L
        tile_l = _megacore_split(tile_l, L, 1, 128, lane_bytes)
        if tile_l >= L:
            tile_l = L
    else:
        # N*C_pad too large for even a 128-lane block: tile the batch dim too.
        tile_l = 128
        tile_n = max(1, blk_cap // (c_pad * 128 * itemsize))
        tile_n = min(tile_n, N)
    grid_n = -(-N // tile_n)
    grid_l = -(-L // tile_l)
    return tile_n, tile_l, grid_n, grid_l


# ----------------------------------------------------------------------------
# Kernels
# ----------------------------------------------------------------------------
def _mean_partial_kernel(thr_ref, x_ref, o_ref, *, R, L, ragged_r, ragged_l):
    """Per-tile f32 partial sum of where(x>=thr, -x, x) over a (1,tr,tl) block.

    The valid-element mask is only applied on edge tiles (gated by pl.when);
    the steady-state path is unmasked.
    """
    x = x_ref[...].astype(jnp.float32)             # (1, tr, tl), f32 once
    thr = thr_ref[0]
    loss = jnp.where(x >= thr, -x, x)
    _, tr, tl = x.shape

    def _write(vals):
        o_ref[...] = jnp.sum(vals, axis=(0, 1, 2), keepdims=True)

    if ragged_r or ragged_l:
        i = pl.program_id(0)
        j = pl.program_id(1)
        conds = []
        if ragged_r:
            conds.append(i == pl.num_programs(0) - 1)
        if ragged_l:
            conds.append(j == pl.num_programs(1) - 1)
        edge = conds[0]
        for c in conds[1:]:
            edge = jnp.logical_or(edge, c)

        @pl.when(edge)
        def _():
            masked = loss
            if ragged_r:
                row = i * tr + jax.lax.broadcasted_iota(jnp.int32, (1, tr, 1), 1)
                masked = jnp.where(row < R, masked, 0.0)
            if ragged_l:
                col = j * tl + jax.lax.broadcasted_iota(jnp.int32, (1, 1, tl), 2)
                masked = jnp.where(col < L, masked, 0.0)
            _write(masked)

        @pl.when(jnp.logical_not(edge))
        def _():
            _write(loss)
    else:
        _write(loss)


def _channel_sum_kernel(thr_ref, x_ref, o_ref):
    """Per-pixel channel sum (reduction == 'sum' path).

    Ragged tails are handled by Pallas clipping the edge output blocks, so no
    in-kernel mask is needed (keep full-block stores via o_ref[...]).
    """
    x = x_ref[...].astype(jnp.float32)             # (tn, C, tl)
    thr = thr_ref[0]
    loss = jnp.where(x >= thr, -x, x)
    o_ref[...] = jnp.sum(loss, axis=1, keepdims=True).astype(o_ref.dtype)


# ----------------------------------------------------------------------------
# Wrapper
# ----------------------------------------------------------------------------
def contrast_loss(x, threshold=0.5, reduction="mean", *, _blk_cap_bytes=None):
    """x: (N, C, H, W), NCHW layout (matches the PyTorch module)."""
    if reduction not in ("mean", "batchmean", "sum"):
        raise Exception(f"{reduction} type reduction not supported for Contrast Loss")

    N, C, H, W = x.shape
    HW = H * W
    itemsize = jnp.dtype(x.dtype).itemsize

    vmem_limit, blk_cap = _vmem_budget()
    if _blk_cap_bytes is not None:                 # test hook: force small tiles
        blk_cap = int(_blk_cap_bytes)

    thr = jnp.asarray([threshold], dtype=jnp.float32)
    cparams = pltpu.CompilerParams(
        dimension_semantics=("parallel", "parallel"),
        vmem_limit_bytes=int(vmem_limit),
    )

    if reduction in ("mean", "batchmean"):
        # Dense (1, N*C, HW) view: no per-channel sublane padding.
        R, L = N * C, HW
        tile_r, tile_l, grid_r, grid_l = _plan_mean_tiles(R, L, itemsize, blk_cap)
        ragged_r = (R % tile_r) != 0
        ragged_l = (L % tile_l) != 0
        n_steps = grid_r * grid_l

        kern = functools.partial(
            _mean_partial_kernel, R=R, L=L, ragged_r=ragged_r, ragged_l=ragged_l
        )
        partials = pl.pallas_call(
            kern,
            out_shape=jax.ShapeDtypeStruct((n_steps, 1, 1), jnp.float32),
            grid_spec=pltpu.PrefetchScalarGridSpec(
                num_scalar_prefetch=1,
                grid=(grid_r, grid_l),
                in_specs=[pl.BlockSpec((1, tile_r, tile_l),
                                       lambda i, j, thr_ref: (0, i, j))],
                out_specs=pl.BlockSpec((1, 1, 1),
                                       lambda i, j, thr_ref, gl=grid_l:
                                       (i * gl + j, 0, 0)),
            ),
            compiler_params=cparams,
        )(thr, x.reshape(1, R, L))
        return (jnp.sum(partials) / (N * HW)).astype(x.dtype)

    # reduction == "sum": PyTorch module returns the dim=1 sum map, shape (N, H, W).
    tile_n, tile_l, grid_n, grid_l = _plan_sum_tiles(N, C, HW, itemsize, blk_cap)
    per_pixel = pl.pallas_call(
        _channel_sum_kernel,
        out_shape=jax.ShapeDtypeStruct((N, 1, HW), x.dtype),
        grid_spec=pltpu.PrefetchScalarGridSpec(
            num_scalar_prefetch=1,
            grid=(grid_n, grid_l),
            in_specs=[pl.BlockSpec((tile_n, C, tile_l),
                                   lambda i, j, thr_ref: (i, 0, j))],
            out_specs=pl.BlockSpec((tile_n, 1, tile_l),
                                   lambda i, j, thr_ref: (i, 0, j)),
        ),
        compiler_params=cparams,
    )(thr, x.reshape(N, C, HW))
    return per_pixel.reshape(N, H, W)


# ----------------------------------------------------------------------------
# Reference + test
# ----------------------------------------------------------------------------
def _reference(x, threshold=0.5, reduction="mean"):
    mask = (x >= threshold).astype(x.dtype)
    loss = (x * (1 - mask) - x * mask).sum(axis=1)
    if reduction in ("mean", "batchmean"):
        loss = loss.mean()
    return loss


if __name__ == "__main__":
    key = jax.random.PRNGKey(0)
    N, C, H, W = 2, 4, 16, 16
    x = jax.random.uniform(key, (N, C, H, W), dtype=jnp.float32)

    # mean path (fused partial-sum reduction)
    out = jax.block_until_ready(contrast_loss(x, threshold=0.5, reduction="mean"))
    ref = _reference(x, threshold=0.5, reduction="mean")
    assert jnp.allclose(out, ref, atol=1e-5, rtol=1e-5), (out, ref)

    # batchmean path (identical to mean for this module)
    out_bm = jax.block_until_ready(contrast_loss(x, threshold=0.5, reduction="batchmean"))
    assert jnp.allclose(out_bm, ref, atol=1e-5, rtol=1e-5), (out_bm, ref)

    # sum path (per-pixel channel sums, no final mean)
    out_sum = jax.block_until_ready(contrast_loss(x, threshold=0.5, reduction="sum"))
    ref_sum = _reference(x, threshold=0.5, reduction="sum")
    assert jnp.allclose(out_sum, ref_sum, atol=1e-5, rtol=1e-5)

    # Ragged, oddly-shaped input with tiny forced tiles to exercise the
    # pl.when-gated edge masks and multi-axis grids.
    x2 = jax.random.normal(jax.random.PRNGKey(1), (3, 5, 17, 19), dtype=jnp.float32)
    out2 = jax.block_until_ready(
        contrast_loss(x2, threshold=0.1, reduction="mean", _blk_cap_bytes=4096))
    ref2 = _reference(x2, threshold=0.1, reduction="mean")
    assert jnp.allclose(out2, ref2, atol=1e-4, rtol=1e-4), (out2, ref2)
    out2s = jax.block_until_ready(
        contrast_loss(x2, threshold=0.1, reduction="sum", _blk_cap_bytes=4096))
    ref2s = _reference(x2, threshold=0.1, reduction="sum")
    assert jnp.allclose(out2s, ref2s, atol=1e-4, rtol=1e-4)

    print("KERNEL_OK")
</pallas_src>

<mosaic_0001>
module attributes {stable_mosaic.version = 11 : i64} {
  func.func @_mean_partial_kernel(%arg0: i32, %arg1: i32, %arg2: memref<1xf32, #tpu.memory_space<smem>>, %arg3: memref<1x8x256xf32, #tpu.memory_space<vmem>>, %arg4: memref<1x1x1xf32, #tpu.memory_space<vmem>>) attributes {dimension_semantics = [#tpu.dimension_semantics<parallel>, #tpu.dimension_semantics<parallel>], iteration_bounds = array<i64: 1, 1>, scalar_prefetch = 1 : i64, scratch_operands = 0 : i64, tpu.core_type = #tpu.core_type<tc>, window_params = [{transform_indices = @transform_0, window_bounds = array<i64: 1, 8, 256>}, {transform_indices = @transform_1, window_bounds = array<i64: 1, 1, 1>}]} {
    %c0 = arith.constant 0 : index
    %c0_0 = arith.constant 0 : index
    %c0_1 = arith.constant 0 : index
    %0 = vector.load %arg3[%c0, %c0_0, %c0_1] : memref<1x8x256xf32, #tpu.memory_space<vmem>>, vector<1x8x256xf32>
    %c0_2 = arith.constant 0 : index
    %1 = memref.load %arg2[%c0_2] : memref<1xf32, #tpu.memory_space<smem>>
    %2 = vector.broadcast %1 : f32 to vector<1x8x256xf32>
    %3 = arith.cmpf oge, %0, %2 : vector<1x8x256xf32>
    %cst = arith.constant 0.000000e+00 : f32
    %4 = vector.broadcast %cst : f32 to vector<1x8x256xf32>
    %5 = arith.subf %4, %0 : vector<1x8x256xf32>
    %6 = arith.select %3, %5, %0 : vector<1x8x256xi1>, vector<1x8x256xf32>
    %7 = vector.shape_cast %6 : vector<1x8x256xf32> to vector<1x1x8x256xf32>
    %cst_3 = arith.constant dense<0.000000e+00> : vector<1xf32>
    %8 = vector.multi_reduction <add>, %7, %cst_3 [1, 2, 3] : vector<1x1x8x256xf32> to vector<1xf32>
    %9 = vector.shape_cast %8 : vector<1xf32> to vector<1x1x1x1xf32>
    %10 = vector.extract %9[0, 0, 0, 0] : f32 from vector<1x1x1x1xf32>
    %11 = vector.broadcast %10 : f32 to vector<1x1x1xf32>
    %c0_4 = arith.constant 0 : index
    %c0_5 = arith.constant 0 : index
    %c0_6 = arith.constant 0 : index
    %12 = vector.load %arg4[%c0_4, %c0_5, %c0_6] : memref<1x1x1xf32, #tpu.memory_space<vmem>>, vector<1x1x1xf32>
    tpu.vector_store %arg4[%c0_4, %c0_5, %c0_6], %11 {strides = array<i32>} : memref<1x1x1xf32, #tpu.memory_space<vmem>>, vector<1x1x1xf32>,
    return
  }
  func.func @transform_0(%arg0: i32, %arg1: i32, %arg2: memref<1xf32, #tpu.memory_space<smem>>) -> (i32, i32, i32) {
    %c0_i32 = arith.constant 0 : i32
    %c0_i32_0 = arith.constant 0 : i32
    return %c0_i32, %arg0, %arg1 : i32, i32, i32
  }
  func.func @transform_1(%arg0: i32, %arg1: i32, %arg2: memref<1xf32, #tpu.memory_space<smem>>) -> (i32, i32, i32) {
    %c1_i32 = arith.constant 1 : i32
    %0 = arith.muli %arg0, %c1_i32 : i32
    %1 = arith.addi %0, %arg1 : i32
    %c0_i32 = arith.constant 0 : i32
    %c0_i32_0 = arith.constant 0 : i32
    %c0_i32_1 = arith.constant 0 : i32
    return %1, %c0_i32, %c0_i32_0 : i32, i32, i32
  }
}

</mosaic_0001>

<bundles_post_ra>
// kernel: tpu_custom_call.1
= control target key start
LH: loop header
LB: loop body
LE: loop exit
PB: predicated region body
PF: predicated region fallthrough
CT: control target
= control target key end

     0   :  { %8 = vsyncpa [#allocation5], 0  ;;  %s161_s0 = inlined_call_operand.<no memory space> [shape: f32[1], index: 0, kind: input, shape index: {}]   ;;  %s162_s1 = inlined_call_operand.hbm [shape: f32[1,8,256], index: 1, kind: input, shape index: {}]   ;;  %s163_s2 = inlined_call_operand.hbm [shape: f32[1,1,1], index: 2, kind: output, shape index: {}]  }
   0x1   :  { %9 = vsyncpa [#allocation6], 0  ;;  %s117_s9 = smov [#allocation4]   ;;  %s69_s13 = scalar_lea.hbm %s162_s1, 256 }
   0x2   :  { %s16_s10 = sshll.u32 %s117_s9, 4  ;;  %p70_p0 = scmp.ne.s32.totalorder %s162_s1, %s69_s13  ;;  %s17_s10 = int_to_ptr.vmem [resolvable:$true] %s16_s10 }
   0x3   :  { %p73_p1 = scmp.lt.u32.totalorder %s69_s13, %s162_s1 }
   0x5   :  { %p75_p2 = pnand %p73_p1, %p70_p0 }
   0x7   :  { %78 = shalt.err (!%p75_p2)
}
   0x8   :  { %s79_s18 = scalar_lea.vmem %s17_s10, 256  ;;  %p84_p4 = scmp.lt.s32.totalorder %s17_s10, %s17_s10 }
   0x9   :  { %p80_p3 = scmp.ne.s32.totalorder %s17_s10, %s79_s18  ;;  %p85_p5 = scmp.lt.s32.totalorder %s79_s18, %s79_s18 }
   0xb   :  { %p86_p6 = por %p85_p5, %p84_p4 }
   0xd   :  { %p87_p7 = pnand %p86_p6, %p80_p3 }
   0xf   :  { %90 = shalt.err (!%p87_p7)
}
  0x10   :  { %19 = dma.hbm_to_vmem [thread:$0]  %s162_s1, 256, %s17_s10, [#allocation5]  }
  0x11   :  { %113 = dma.done.wait [#allocation5], 256  }
  0x12   :  { %114 = vsyncadd [#allocation5], 4294967040  ;;  %v27_v0 = vstv %s161_s0  ;;  %v24_v1 = vld [vmem:[#allocation4] sm:$0xff]  ;;  %v25_v2 = vld [vmem:[#allocation4 + $0x8] sm:$0xff]  ;;  %s118_s1 = smov [#allocation7]   ;;  %vm45_vm2 = vcmask 0  }
  0x13   :  { %vm28_vm0 = vcmp.ge.f32.partialorder %v24_v1, %v27_v0  ;;  %vm29_vm1 = vcmp.ge.f32.partialorder %v25_v2, %v27_v0  ;;  %v30_v3 = vsub.f32 0.0, %v24_v1  ;;  %v31_v4 = vsub.f32 0.0, %v25_v2  ;;  %s56_s0 = sshll.u32 %s118_s1, 4  ;;  %s57_s0 = int_to_ptr.vmem [resolvable:$true] %s56_s0 }
  0x14   :  { %s91_s24 = scalar_lea.vmem %s57_s0, 16  ;;  %s95_s25 = scalar_lea.vmem %s57_s0, 32 }
  0x15   :  { %v32_v5 = vsel %vm28_vm0, %v30_v3, %v24_v1  ;;  %v33_v6 = vsel %vm29_vm1, %v31_v4, %v25_v2  ;;  %p92_p8 = scmp.ne.s32.totalorder %s57_s0, %s91_s24  ;;  %p96_p9 = scmp.lt.s32.totalorder %s57_s0, %s57_s0 }
  0x16   :  { %v34_v7 = vadd.f32 %v33_v6, %v32_v5  ;;  %p97_p10 = scmp.lt.s32.totalorder %s95_s25, %s91_s24 }
  0x18   :  { %35 = vadd.xlane.f32.xlu0 %v34_v7  ;;  %p98_p11 = por %p97_p10, %p96_p9 }
  0x1a   :  { %p99_p12 = pnand %p98_p11, %p92_p8 }
  0xa5   :  { %v36_v8 = vpop.xlane.xlu0 %35 }
  0xa6   :  { %v37_v9 = vrot.slane %v36_v8, 4 }
  0xa8   :  { %v38_v10 = vadd.f32 %v37_v9, %v36_v8 }
  0xaa   :  { %v39_v11 = vrot.slane %v38_v10, 2 }
  0xac   :  { %v40_v12 = vadd.f32 %v39_v11, %v38_v10 }
  0xae   :  { %v41_v13 = vrot.slane %v40_v12, 1 }
  0xb0   :  { %v42_v14 = vadd.f32 %v41_v13, %v40_v12 }
  0xb2   :  { %65 = vpush %v42_v14 }
  0xe3   :  { %s66_s23 = spop %65 }
  0xe4   :  { %v44_v15 = vstv %s66_s23 }
  0xe5   :  { %46 = vst.msk [vmem:[#allocation7] sm:$0x1] %vm45_vm2, %v44_v15 }
  0xe6   :  { %102 = shalt.err (!%p99_p12)
}
  0xe7   :  { %s103_s28 = scalar_lea.hbm %s163_s2, 16 }
  0xe8   :  { %p104_p13 = scmp.ne.s32.totalorder %s163_s2, %s103_s28  ;;  %p107_p0 = scmp.lt.u32.totalorder %s103_s28, %s163_s2 }
  0xea   :  { %p109_p1 = pnand %p107_p0, %p104_p13 }
  0xec   :  { %112 = shalt.err (!%p109_p1)
}
  0xed   :  { %59 = dma.vmem_to_hbm [thread:$0]  %s57_s0, 16, %s163_s2, [#allocation6]  }
  0xee   :  { %115 = dma.done.wait [#allocation6], 16  }
  0xef   :  { %116 = vsyncadd [#allocation6], 4294967280 }
  0xf0   :  { %63 = vsyncpa [#allocation5], 1 }
  0xf1   :  { %64 = vsyncpa [#allocation6], 1 }

</bundles_post_ra>
